<compile_context>
chip_gen: v5e
topology: v5e:2x2
jax: 0.10.0
libtpu: 0.0.40
codegen_flags: <defaults>
</compile_context>

<pallas_src>
import functools

import jax
import jax.numpy as jnp
from jax.experimental import pallas as pl
from jax.experimental.pallas import tpu as pltpu


def _critic_kernel(num_layers, obs_ref, act_ref, w0o_ref, w0a_ref, b0_ref,
                   *refs):
    """refs = (W1_bd, b1, W2_bd, b2, ..., out_ref)."""
    out_ref = refs[-1]
    mid = refs[:-1]

    NB, B, A = act_ref.shape
    act = act_ref[...].reshape(NB * B, A)               # fold N into rows
    obs = obs_ref[...]                                  # (B, O)

    # Layer 0, split into obs/act halves; obs projection computed once and
    # broadcast over the NB action-sets in this block.
    h_obs = jnp.dot(obs, w0o_ref[...],
                    preferred_element_type=jnp.float32)        # (B, E*H0)
    h_act = jnp.dot(act, w0a_ref[...],
                    preferred_element_type=jnp.float32)        # (NB*B, E*H0)
    eh0 = h_obs.shape[-1]
    h = h_act + jnp.broadcast_to(h_obs[None], (NB, B, eh0)).reshape(NB * B,
                                                                    eh0)
    h = h + b0_ref[...].astype(jnp.float32)
    if num_layers > 1:
        h = jnp.maximum(h, 0.0)

    # Remaining layers: one fused block-diagonal matmul each.
    for i in range(1, num_layers):
        W = mid[2 * (i - 1)][...]
        bv = mid[2 * (i - 1) + 1][...]
        h = jnp.dot(h.astype(W.dtype), W,
                    preferred_element_type=jnp.float32)
        h = h + bv.astype(jnp.float32)
        if i < num_layers - 1:
            h = jnp.maximum(h, 0.0)

    # h: (NB*B, E)  ->  (NB, B, E) block of the output.
    E = out_ref.shape[-1]
    out_ref[...] = h.reshape(NB, B, E).astype(out_ref.dtype)


def _pack_block_diag(W, dtype):
    """(E, din, dout) per-ensemble weights -> (E*din, E*dout) block-diagonal."""
    E, din, dout = W.shape
    bd = jnp.zeros((E * din, E * dout), dtype)
    for e in range(E):
        bd = bd.at[e * din:(e + 1) * din, e * dout:(e + 1) * dout].set(
            W[e].astype(dtype))
    return bd


def critic_forward(obs, act, weights, biases, compute_dtype=jnp.float32):
    """Pallas implementation of Critic.forward.

    obs: (B, O), act: (B, A) or (N, B, A)
    weights[i]: (E, in_i, out_i), biases[i]: (E, out_i)
    returns: (N, E, B) float32

    compute_dtype: dtype of activations/weights fed to the MXU (accumulation
    is always f32).  jnp.bfloat16 is recommended on v6e/v7x when looser
    tolerances are acceptable.
    """
    if act.ndim == 2:
        act = act[None]
    N, B, A = act.shape
    B2, O = obs.shape
    assert B2 == B
    E, D, H0 = weights[0].shape
    assert D == O + A
    num_layers = len(weights)
    # The kernel assumes the final ensemble-linear has out_dim == 1.
    assert weights[-1].shape[-1] == 1

    # ---- choose how many action-sets to fold per grid step ----------------
    target_rows = 512                       # M rows per block fed to the MXU
    NB = max(1, min(N, max(1, target_rows // max(B, 1))))
    num_blocks = -(-N // NB)                # cdiv
    N_pad = num_blocks * NB
    if N_pad != N:
        act = jnp.pad(act, ((0, N_pad - N), (0, 0), (0, 0)))

    obs_c = obs.astype(compute_dtype)
    act_c = act.astype(compute_dtype)

    # ---- pack weights ------------------------------------------------------
    # Layer 0: (E, D, H0) -> (D, E*H0), then split rows into obs / act parts.
    W0p = jnp.transpose(weights[0].astype(compute_dtype),
                        (1, 0, 2)).reshape(D, E * H0)
    w0_obs = W0p[:O]                        # (O, E*H0)
    w0_act = W0p[O:]                        # (A, E*H0)
    b0p = biases[0].astype(compute_dtype).reshape(1, E * H0)

    packed = []
    packed_specs = []
    for i in range(1, num_layers):
        Wi = weights[i]
        _, din, dout = Wi.shape
        Wbd = _pack_block_diag(Wi, compute_dtype)           # (E*din, E*dout)
        bi = biases[i].astype(compute_dtype).reshape(1, E * dout)
        packed += [Wbd, bi]
        packed_specs += [
            pl.BlockSpec((E * din, E * dout), lambda n: (0, 0)),
            pl.BlockSpec((1, E * dout), lambda n: (0, 0)),
        ]

    kernel = functools.partial(_critic_kernel, num_layers)

    out = pl.pallas_call(
        kernel,
        out_shape=jax.ShapeDtypeStruct((N_pad, B, E), jnp.float32),
        grid_spec=pltpu.PrefetchScalarGridSpec(
            num_scalar_prefetch=0,
            grid=(num_blocks,),
            in_specs=[
                pl.BlockSpec((B, O), lambda n: (0, 0)),          # obs (shared)
                pl.BlockSpec((NB, B, A), lambda n: (n, 0, 0)),   # act block
                pl.BlockSpec((O, E * H0), lambda n: (0, 0)),     # W0_obs
                pl.BlockSpec((A, E * H0), lambda n: (0, 0)),     # W0_act
                pl.BlockSpec((1, E * H0), lambda n: (0, 0)),     # b0
            ] + packed_specs,
            out_specs=pl.BlockSpec((NB, B, E), lambda n: (n, 0, 0)),
        ),
        compiler_params=pltpu.CompilerParams(
            dimension_semantics=("parallel",),
        ),
    )(obs_c, act_c, w0_obs, w0_act, b0p, *packed)

    out = out[:N]                                # (N, B, E), drop N padding
    return jnp.transpose(out, (0, 2, 1))         # (N, E, B)


def _reference_forward(obs, act, weights, biases):
    """Pure-JAX reference matching the PyTorch module semantics."""
    if act.ndim == 2:
        act = act[None]
    N, B, A = act.shape
    _, O = obs.shape
    obs_rep = jnp.broadcast_to(obs[None], (N, B, O))
    xs = jnp.concatenate([obs_rep, act], axis=-1)
    qs = []
    for n in range(N):
        E = weights[0].shape[0]
        h = jnp.broadcast_to(xs[n][None], (E, B, O + A))
        for i, (W, b) in enumerate(zip(weights, biases)):
            h = jnp.einsum("ebi,eio->ebo", h, W) + b[:, None, :]
            if i < len(weights) - 1:
                h = jnp.maximum(h, 0.0)
        qs.append(h[..., 0])
    return jnp.stack(qs, axis=0)


def make_params(key, obs_dim, act_dim, ensemble_size, hidden_sizes):
    sizes = [obs_dim + act_dim] + list(hidden_sizes) + [1]
    weights, biases = [], []
    for i in range(len(sizes) - 1):
        key, kw, kb = jax.random.split(key, 3)
        fan_in = sizes[i]
        scale = 1.0 / jnp.sqrt(jnp.float32(fan_in))
        W = jax.random.uniform(kw, (ensemble_size, sizes[i], sizes[i + 1]),
                               jnp.float32, -scale, scale)
        b = jax.random.uniform(kb, (ensemble_size, sizes[i + 1]),
                               jnp.float32, -scale, scale)
        weights.append(W)
        biases.append(b)
    return weights, biases


if __name__ == "__main__":
    obs_dim, act_dim = 16, 16
    ensemble_size = 4            # E*H = 4*32 = 128 -> one full vreg lane width
    hidden_sizes = (32, 32)
    B, N = 8, 2

    key = jax.random.PRNGKey(0)
    key, k_obs, k_act, k_par = jax.random.split(key, 4)
    obs = jax.random.normal(k_obs, (B, obs_dim), jnp.float32)
    act = jax.random.normal(k_act, (N, B, act_dim), jnp.float32)
    weights, biases = make_params(k_par, obs_dim, act_dim,
                                  ensemble_size, hidden_sizes)

    qs = critic_forward(obs, act, weights, biases)
    qs = jax.block_until_ready(qs)

    qs_ref = _reference_forward(obs, act, weights, biases)
    assert qs.shape == (N, ensemble_size, B)
    assert jnp.allclose(qs, qs_ref, atol=1e-4, rtol=1e-4)

    print("KERNEL_OK")
</pallas_src>

<mosaic_0001>
module attributes {stable_mosaic.version = 11 : i64} {
  func.func @_critic_kernel(%arg0: i32, %arg1: memref<8x16xf32, #tpu.memory_space<vmem>>, %arg2: memref<2x8x16xf32, #tpu.memory_space<vmem>>, %arg3: memref<16x128xf32, #tpu.memory_space<vmem>>, %arg4: memref<16x128xf32, #tpu.memory_space<vmem>>, %arg5: memref<1x128xf32, #tpu.memory_space<vmem>>, %arg6: memref<128x128xf32, #tpu.memory_space<vmem>>, %arg7: memref<1x128xf32, #tpu.memory_space<vmem>>, %arg8: memref<128x4xf32, #tpu.memory_space<vmem>>, %arg9: memref<1x4xf32, #tpu.memory_space<vmem>>, %arg10: memref<2x8x4xf32, #tpu.memory_space<vmem>>) attributes {dimension_semantics = [#tpu.dimension_semantics<parallel>], iteration_bounds = array<i64: 1>, scalar_prefetch = 0 : i64, scratch_operands = 0 : i64, tpu.core_type = #tpu.core_type<tc>, window_params = [{pipeline_mode = #tpu.pipeline_mode<synchronous>, transform_indices = @transform_0, window_bounds = array<i64: 8, 16>}, {transform_indices = @transform_1, window_bounds = array<i64: 2, 8, 16>}, {pipeline_mode = #tpu.pipeline_mode<synchronous>, transform_indices = @transform_2, window_bounds = array<i64: 16, 128>}, {pipeline_mode = #tpu.pipeline_mode<synchronous>, transform_indices = @transform_3, window_bounds = array<i64: 16, 128>}, {pipeline_mode = #tpu.pipeline_mode<synchronous>, transform_indices = @transform_4, window_bounds = array<i64: 1, 128>}, {pipeline_mode = #tpu.pipeline_mode<synchronous>, transform_indices = @transform_5, window_bounds = array<i64: 128, 128>}, {pipeline_mode = #tpu.pipeline_mode<synchronous>, transform_indices = @transform_6, window_bounds = array<i64: 1, 128>}, {pipeline_mode = #tpu.pipeline_mode<synchronous>, transform_indices = @transform_7, window_bounds = array<i64: 128, 4>}, {pipeline_mode = #tpu.pipeline_mode<synchronous>, transform_indices = @transform_8, window_bounds = array<i64: 1, 4>}, {transform_indices = @transform_9, window_bounds = array<i64: 2, 8, 4>}]} {
    %c0 = arith.constant 0 : index
    %c0_0 = arith.constant 0 : index
    %c0_1 = arith.constant 0 : index
    %0 = vector.load %arg2[%c0, %c0_0, %c0_1] : memref<2x8x16xf32, #tpu.memory_space<vmem>>, vector<2x8x16xf32>
    %1 = vector.shape_cast %0 : vector<2x8x16xf32> to vector<16x16xf32>
    %c0_2 = arith.constant 0 : index
    %c0_3 = arith.constant 0 : index
    %2 = vector.load %arg1[%c0_2, %c0_3] : memref<8x16xf32, #tpu.memory_space<vmem>>, vector<8x16xf32>
    %c0_4 = arith.constant 0 : index
    %c0_5 = arith.constant 0 : index
    %3 = vector.load %arg3[%c0_4, %c0_5] : memref<16x128xf32, #tpu.memory_space<vmem>>, vector<16x128xf32>
    %cst = arith.constant dense<0.000000e+00> : vector<8x128xf32>
    %4 = tpu.matmul %2, %3, %cst {dimension_numbers = #tpu.dot_dimension_numbers<[1], [0], [0], [1], [0, 0, 1, 1], [], []>} : vector<8x16xf32>, vector<16x128xf32>, vector<8x128xf32> -> vector<8x128xf32>
    %c0_6 = arith.constant 0 : index
    %c0_7 = arith.constant 0 : index
    %5 = vector.load %arg4[%c0_6, %c0_7] : memref<16x128xf32, #tpu.memory_space<vmem>>, vector<16x128xf32>
    %cst_8 = arith.constant dense<0.000000e+00> : vector<16x128xf32>
    %6 = tpu.matmul %1, %5, %cst_8 {dimension_numbers = #tpu.dot_dimension_numbers<[1], [0], [0], [1], [0, 0, 1, 1], [], []>} : vector<16x16xf32>, vector<16x128xf32>, vector<16x128xf32> -> vector<16x128xf32>
    %7 = vector.shape_cast %4 : vector<8x128xf32> to vector<1x8x128xf32>
    %8 = vector.shape_cast %7 : vector<1x8x128xf32> to vector<1x8x128xf32>
    %9 = vector.broadcast %8 : vector<1x8x128xf32> to vector<2x8x128xf32>
    %10 = vector.shape_cast %9 : vector<2x8x128xf32> to vector<16x128xf32>
    %11 = arith.addf %6, %10 : vector<16x128xf32>
    %c0_9 = arith.constant 0 : index
    %c0_10 = arith.constant 0 : index
    %12 = vector.load %arg5[%c0_9, %c0_10] : memref<1x128xf32, #tpu.memory_space<vmem>>, vector<1x128xf32>
    %13 = vector.broadcast %12 : vector<1x128xf32> to vector<16x128xf32>
    %14 = arith.addf %11, %13 : vector<16x128xf32>
    %cst_11 = arith.constant 0.000000e+00 : f32
    %15 = vector.broadcast %cst_11 : f32 to vector<16x128xf32>
    %16 = arith.maximumf %14, %15 : vector<16x128xf32>
    %c0_12 = arith.constant 0 : index
    %c0_13 = arith.constant 0 : index
    %17 = vector.load %arg6[%c0_12, %c0_13] : memref<128x128xf32, #tpu.memory_space<vmem>>, vector<128x128xf32>
    %c0_14 = arith.constant 0 : index
    %c0_15 = arith.constant 0 : index
    %18 = vector.load %arg7[%c0_14, %c0_15] : memref<1x128xf32, #tpu.memory_space<vmem>>, vector<1x128xf32>
    %cst_16 = arith.constant dense<0.000000e+00> : vector<16x128xf32>
    %19 = tpu.matmul %16, %17, %cst_16 {dimension_numbers = #tpu.dot_dimension_numbers<[1], [0], [0], [1], [0, 0, 1, 1], [], []>} : vector<16x128xf32>, vector<128x128xf32>, vector<16x128xf32> -> vector<16x128xf32>
    %20 = vector.broadcast %18 : vector<1x128xf32> to vector<16x128xf32>
    %21 = arith.addf %19, %20 : vector<16x128xf32>
    %cst_17 = arith.constant 0.000000e+00 : f32
    %22 = vector.broadcast %cst_17 : f32 to vector<16x128xf32>
    %23 = arith.maximumf %21, %22 : vector<16x128xf32>
    %c0_18 = arith.constant 0 : index
    %c0_19 = arith.constant 0 : index
    %24 = vector.load %arg8[%c0_18, %c0_19] : memref<128x4xf32, #tpu.memory_space<vmem>>, vector<128x4xf32>
    %c0_20 = arith.constant 0 : index
    %c0_21 = arith.constant 0 : index
    %25 = vector.load %arg9[%c0_20, %c0_21] : memref<1x4xf32, #tpu.memory_space<vmem>>, vector<1x4xf32>
    %cst_22 = arith.constant dense<0.000000e+00> : vector<16x4xf32>
    %26 = tpu.matmul %23, %24, %cst_22 {dimension_numbers = #tpu.dot_dimension_numbers<[1], [0], [0], [1], [0, 0, 1, 1], [], []>} : vector<16x128xf32>, vector<128x4xf32>, vector<16x4xf32> -> vector<16x4xf32>
    %27 = vector.broadcast %25 : vector<1x4xf32> to vector<16x4xf32>
    %28 = arith.addf %26, %27 : vector<16x4xf32>
    %29 = vector.shape_cast %28 : vector<16x4xf32> to vector<2x8x4xf32>
    %c0_23 = arith.constant 0 : index
    %c0_24 = arith.constant 0 : index
    %c0_25 = arith.constant 0 : index
    %30 = vector.load %arg10[%c0_23, %c0_24, %c0_25] : memref<2x8x4xf32, #tpu.memory_space<vmem>>, vector<2x8x4xf32>
    tpu.vector_store %arg10[%c0_23, %c0_24, %c0_25], %29 {strides = array<i32>} : memref<2x8x4xf32, #tpu.memory_space<vmem>>, vector<2x8x4xf32>,
    return
  }
  func.func @transform_0(%arg0: i32) -> (i32, i32) {
    %c0_i32 = arith.constant 0 : i32
    %c0_i32_0 = arith.constant 0 : i32
    %c0_i32_1 = arith.constant 0 : i32
    return %c0_i32, %c0_i32_0 : i32, i32
  }
  func.func @transform_1(%arg0: i32) -> (i32, i32, i32) {
    %c0_i32 = arith.constant 0 : i32
    %c0_i32_0 = arith.constant 0 : i32
    %c0_i32_1 = arith.constant 0 : i32
    return %arg0, %c0_i32, %c0_i32_0 : i32, i32, i32
  }
  func.func @transform_2(%arg0: i32) -> (i32, i32) {
    %c0_i32 = arith.constant 0 : i32
    %c0_i32_0 = arith.constant 0 : i32
    %c0_i32_1 = arith.constant 0 : i32
    return %c0_i32, %c0_i32_0 : i32, i32
  }
  func.func @transform_3(%arg0: i32) -> (i32, i32) {
    %c0_i32 = arith.constant 0 : i32
    %c0_i32_0 = arith.constant 0 : i32
    %c0_i32_1 = arith.constant 0 : i32
    return %c0_i32, %c0_i32_0 : i32, i32
  }
  func.func @transform_4(%arg0: i32) -> (i32, i32) {
    %c0_i32 = arith.constant 0 : i32
    %c0_i32_0 = arith.constant 0 : i32
    %c0_i32_1 = arith.constant 0 : i32
    return %c0_i32, %c0_i32_0 : i32, i32
  }
  func.func @transform_5(%arg0: i32) -> (i32, i32) {
    %c0_i32 = arith.constant 0 : i32
    %c0_i32_0 = arith.constant 0 : i32
    %c0_i32_1 = arith.constant 0 : i32
    return %c0_i32, %c0_i32_0 : i32, i32
  }
  func.func @transform_6(%arg0: i32) -> (i32, i32) {
    %c0_i32 = arith.constant 0 : i32
    %c0_i32_0 = arith.constant 0 : i32
    %c0_i32_1 = arith.constant 0 : i32
    return %c0_i32, %c0_i32_0 : i32, i32
  }
  func.func @transform_7(%arg0: i32) -> (i32, i32) {
    %c0_i32 = arith.constant 0 : i32
    %c0_i32_0 = arith.constant 0 : i32
    %c0_i32_1 = arith.constant 0 : i32
    return %c0_i32, %c0_i32_0 : i32, i32
  }
  func.func @transform_8(%arg0: i32) -> (i32, i32) {
    %c0_i32 = arith.constant 0 : i32
    %c0_i32_0 = arith.constant 0 : i32
    %c0_i32_1 = arith.constant 0 : i32
    return %c0_i32, %c0_i32_0 : i32, i32
  }
  func.func @transform_9(%arg0: i32) -> (i32, i32, i32) {
    %c0_i32 = arith.constant 0 : i32
    %c0_i32_0 = arith.constant 0 : i32
    %c0_i32_1 = arith.constant 0 : i32
    return %arg0, %c0_i32, %c0_i32_0 : i32, i32, i32
  }
}

</mosaic_0001>

<bundles_post_ra>
// kernel: tpu_custom_call.1
= control target key start
LH: loop header
LB: loop body
LE: loop exit
PB: predicated region body
PF: predicated region fallthrough
CT: control target
= control target key end

     0   :  { %14 = vsyncpa [#allocation3], 0  ;;  %s587_s0 = inlined_call_operand.hbm [shape: f32[8,16], index: 0, kind: input, shape index: {}]   ;;  %s588_s1 = inlined_call_operand.hbm [shape: f32[2,8,16], index: 1, kind: input, shape index: {}]   ;;  %s589_s2 = inlined_call_operand.hbm [shape: f32[16,128], index: 2, kind: input, shape index: {}]   ;;  %s590_s3 = inlined_call_operand.hbm [shape: f32[16,128], index: 3, kind: input, shape index: {}]   ;;  %s591_s4 = inlined_call_operand.vmem [shape: f32[1,128], index: 4, kind: input, shape index: {}]   ;;  %s592_s5 = inlined_call_operand.vmem [shape: f32[128,128], index: 5, kind: input, shape index: {}]   ;;  %s593_s6 = inlined_call_operand.vmem [shape: f32[1,128], index: 6, kind: input, shape index: {}]   ;;  %s594_s7 = inlined_call_operand.vmem [shape: f32[128,4], index: 7, kind: input, shape index: {}]   ;;  %s595_s8 = inlined_call_operand.vmem [shape: f32[1,4], index: 8, kind: input, shape index: {}]   ;;  %s596_s9 = inlined_call_operand.vmem [shape: f32[2,8,4], index: 9, kind: output, shape index: {}]  }
   0x1   :  { %15 = vsyncpa [#allocation5], 0  ;;  %s32_s11 = sshll.u32 %s588_s1, 4  ;;  %s33_s11 = int_to_ptr.hbm [resolvable:$true] %s32_s11 }
   0x2   :  { %16 = vsyncpa [#allocation8], 0  ;;  %s405_s12 = smov [#allocation4]   ;;  %s22_s16 = sshll.u32 %s587_s0, 4  ;;  %s23_s16 = int_to_ptr.hbm [resolvable:$true] %s22_s16 }
   0x3   :  { %s34_s13 = sshll.u32 %s405_s12, 4  ;;  %s406_s17 = smov 128   ;;  %s35_s13 = int_to_ptr.vmem [resolvable:$true] %s34_s13 }
   0x4   :  { %s407_s18 = smov 8   ;;  %s408_s19 = smov [#allocation2]  }
   0x5   :  { %40 = dma.hbm_to_vmem [thread:$0]  %s33_s11, 256, %s35_s13, [#allocation5], %s406_s17, %s406_s17, %s407_s18  }
   0x6   :  { %s24_s20 = sshll.u32 %s408_s19, 4  ;;  %s45_s23 = sshll.u32 %s589_s2, 4  ;;  %s25_s20 = int_to_ptr.vmem [resolvable:$true] %s24_s20  ;;  %s46_s23 = int_to_ptr.hbm [resolvable:$true] %s45_s23 }
   0x7   :  { %27 = dma.hbm_to_vmem [thread:$0]  %s23_s16, 128, %s25_s20, [#allocation3]  }
   0x8   :  { %s58_s25 = sshll.u32 %s590_s3, 4  ;;  %s409_s26 = smov [#allocation6]   ;;  %s59_s25 = int_to_ptr.hbm [resolvable:$true] %s58_s25 }
   0x9   :  { %s47_s27 = sshll.u32 %s409_s26, 4  ;;  %s410_s0 = smov [#allocation7]   ;;  %s48_s27 = int_to_ptr.vmem [resolvable:$true] %s47_s27 }
   0xa   :  { %53 = dma.hbm_to_vmem [thread:$0]  %s46_s23, 256, %s48_s27, [#allocation5], %s406_s17, %s406_s17, %s407_s18  }
   0xb   :  { %s60_s28 = sshll.u32 %s410_s0, 4  ;;  %s61_s28 = int_to_ptr.vmem [resolvable:$true] %s60_s28 }
   0xc   :  { %66 = dma.hbm_to_vmem [thread:$0]  %s59_s25, 256, %s61_s28, [#allocation8], %s406_s17, %s406_s17, %s407_s18  }
   0xd   :  { %399 = dma.done.wait [#allocation3], 128  }
   0xe   :  { %400 = vsyncadd [#allocation3], 4294967168 }
   0xf   :  { %401 = dma.done.wait [#allocation5], 512  }
  0x10   :  { %402 = vsyncadd [#allocation5], 4294966784 }
  0x11   :  { %403 = dma.done.wait [#allocation8], 256  }
  0x12   :  { %404 = vsyncadd [#allocation8], 4294967040  ;;  %v97_v0 = vld [vmem:[#allocation6 + $0x8] sm:$0xff]  ;;  %v123_v1 = vld [vmem:[#allocation7 + $0x8] sm:$0xff]  ;;  %vm98_vm0 = vcmask 130048   ;;  %vm249_vm1 = vcmask 31744  }
  0x13   :  { %v96_v2 = vld [vmem:[#allocation6] sm:$0xff]  ;;  %116 = vmatpush.msra.mxu0 %v97_v0  ;;  %144 = vmatpush.msra.mxu1 %v123_v1  ;;  %v122_v3 = vld [vmem:[#allocation7] sm:$0xff]  ;;  %v95_v4 = vld [vmem:[#allocation2] sm:$0xff] }
  0x14   :  { %v93_v5 = vld [vmem:[#allocation4] sm:$0xff]  ;;  %v176_v6 = vld [vmem:[%s592_s5 + $0x78] sm:$0xff]  ;;  %v175_v7 = vld [vmem:[%s592_s5 + $0x70] sm:$0xff] }
  0x15   :  { %117 = vmatpush.msra.mxu0 %v96_v2  ;;  %145 = vmatpush.msra.mxu1 %v122_v3  ;;  %v174_v8 = vld [vmem:[%s592_s5 + $0x68] sm:$0xff]  ;;  %v173_v9 = vld [vmem:[%s592_s5 + $0x60] sm:$0xff]  ;;  %v94_v10 = vld [vmem:[#allocation4 + $0x8] sm:$0xff] }
  0x16   :  { %259 = vmatmul.msk.f32.vlgmr.msra.gmra.mxu0 %vm98_vm0, %v95_v4  ;;  %260 = vmatmul.msk.f32.vlgmr.msra.gmra.mxu1 %vm98_vm0, %v93_v5  ;;  %v172_v11 = vld [vmem:[%s592_s5 + $0x58] sm:$0xff]  ;;  %v171_v12 = vld [vmem:[%s592_s5 + $0x50] sm:$0xff]  ;;  %v170_v13 = vld [vmem:[%s592_s5 + $0x48] sm:$0xff] }
  0x17   :  { %181 = vmatpush.msrb.mxu0 %v176_v6  ;;  %262 = vmatpush.msra.mxu2 %v176_v6  ;;  %v169_v14 = vld [vmem:[%s592_s5 + $0x40] sm:$0xff]  ;;  %v168_v15 = vld [vmem:[%s592_s5 + $0x38] sm:$0xff]  ;;  %v167_v16 = vld [vmem:[%s592_s5 + $0x30] sm:$0xff] }
  0x18   :  { %v166_v17 = vld [vmem:[%s592_s5 + $0x28] sm:$0xff]  ;;  %v165_v18 = vld [vmem:[%s592_s5 + $0x20] sm:$0xff]  ;;  %v164_v19 = vld [vmem:[%s592_s5 + $0x18] sm:$0xff] }
  0x19   :  { %182 = vmatpush.msrb.mxu0 %v175_v7  ;;  %263 = vmatpush.msra.mxu2 %v175_v7  ;;  %v163_v20 = vld [vmem:[%s592_s5 + $0x10] sm:$0xff]  ;;  %v162_v21 = vld [vmem:[%s592_s5 + $0x8] sm:$0xff]  ;;  %v161_v22 = vld [vmem:[%s592_s5] sm:$0xff] }
  0x1a   :  { %v221_v23 = vld [vmem:[%s594_s7 + $0x78] sm:$0xff]  ;;  %v220_v24 = vld [vmem:[%s594_s7 + $0x70] sm:$0xff]  ;;  %v219_v25 = vld [vmem:[%s594_s7 + $0x68] sm:$0xff] }
  0x1b   :  { %183 = vmatpush.msrb.mxu0 %v174_v8  ;;  %264 = vmatpush.msra.mxu2 %v174_v8  ;;  %v218_v26 = vld [vmem:[%s594_s7 + $0x60] sm:$0xff]  ;;  %v217_v27 = vld [vmem:[%s594_s7 + $0x58] sm:$0xff]  ;;  %v216_v28 = vld [vmem:[%s594_s7 + $0x50] sm:$0xff] }
  0x1c   :  { %226 = vmatpush.msrb.mxu1 %v221_v23  ;;  %278 = vmatpush.msra.mxu3 %v221_v23  ;;  %v215_v29 = vld [vmem:[%s594_s7 + $0x48] sm:$0xff]  ;;  %v214_v30 = vld [vmem:[%s594_s7 + $0x40] sm:$0xff]  ;;  %v213_v31 = vld [vmem:[%s594_s7 + $0x38] sm:$0xff] }
  0x1d   :  { %184 = vmatpush.msrb.mxu0 %v173_v9  ;;  %265 = vmatpush.msra.mxu2 %v173_v9  ;;  %v300_v32 = vld [vmem:[%s591_s4] ss:$0 sm:$0xff]  ;;  %v212_v33 = vld [vmem:[%s594_s7 + $0x30] sm:$0xff]  ;;  %v211_v37 = vld [vmem:[%s594_s7 + $0x28] sm:$0xff] }
  0x1e   :  { %261 = vmatmul.msk.f32.gmra.mxu1 %vm98_vm0, %v94_v10  ;;  %279 = vmatpush.msra.mxu3 %v220_v24  ;;  %v210_v39 = vld [vmem:[%s594_s7 + $0x20] sm:$0xff]  ;;  %v209_v41 = vld [vmem:[%s594_s7 + $0x18] sm:$0xff]  ;;  %v208_v46 = vld [vmem:[%s594_s7 + $0x10] sm:$0xff] }
  0x1f   :  { %185 = vmatpush.msrb.mxu0 %v172_v11  ;;  %266 = vmatpush.msra.mxu2 %v172_v11  ;;  %v207_v47 = vld [vmem:[%s594_s7 + $0x8] sm:$0xff]  ;;  %v206_v48 = vld [vmem:[%s594_s7] sm:$0xff] }
  0x20   :  { %227 = vmatpush.msrb.mxu1 %v220_v24  ;;  %280 = vmatpush.msra.mxu3 %v219_v25  ;;  %v301_v49 = vld [vmem:[%s593_s6] ss:$0 sm:$0xff] }
  0x21   :  { %186 = vmatpush.msrb.mxu0 %v171_v12  ;;  %267 = vmatpush.msra.mxu2 %v171_v12  ;;  %v302_v56 = vld [vmem:[%s595_s8] ss:$0 sm:$0xff] }
  0x22   :  { %228 = vmatpush.msrb.mxu1 %v219_v25  ;;  %281 = vmatpush.msra.mxu3 %v218_v26 }
  0x23   :  { %187 = vmatpush.msrb.mxu0 %v170_v13  ;;  %268 = vmatpush.msra.mxu2 %v170_v13 }
  0x24   :  { %229 = vmatpush.msrb.mxu1 %v218_v26  ;;  %282 = vmatpush.msra.mxu3 %v217_v27 }
  0x25   :  { %188 = vmatpush.msrb.mxu0 %v169_v14  ;;  %269 = vmatpush.msra.mxu2 %v169_v14 }
  0x26   :  { %230 = vmatpush.msrb.mxu1 %v217_v27  ;;  %283 = vmatpush.msra.mxu3 %v216_v28 }
  0x27   :  { %189 = vmatpush.msrb.mxu0 %v168_v15  ;;  %270 = vmatpush.msra.mxu2 %v168_v15 }
  0x28   :  { %231 = vmatpush.msrb.mxu1 %v216_v28  ;;  %284 = vmatpush.msra.mxu3 %v215_v29 }
  0x29   :  { %190 = vmatpush.msrb.mxu0 %v167_v16  ;;  %271 = vmatpush.msra.mxu2 %v167_v16 }
  0x2a   :  { %232 = vmatpush.msrb.mxu1 %v215_v29  ;;  %285 = vmatpush.msra.mxu3 %v214_v30 }
  0x2b   :  { %191 = vmatpush.msrb.mxu0 %v166_v17  ;;  %272 = vmatpush.msra.mxu2 %v166_v17 }
  0x2c   :  { %233 = vmatpush.msrb.mxu1 %v214_v30  ;;  %286 = vmatpush.msra.mxu3 %v213_v31 }
  0x2d   :  { %192 = vmatpush.msrb.mxu0 %v165_v18  ;;  %273 = vmatpush.msra.mxu2 %v165_v18 }
  0x2e   :  { %234 = vmatpush.msrb.mxu1 %v213_v31  ;;  %287 = vmatpush.msra.mxu3 %v212_v33 }
  0x2f   :  { %193 = vmatpush.msrb.mxu0 %v164_v19  ;;  %274 = vmatpush.msra.mxu2 %v164_v19 }
  0x30   :  { %235 = vmatpush.msrb.mxu1 %v212_v33  ;;  %288 = vmatpush.msra.mxu3 %v211_v37 }
  0x31   :  { %194 = vmatpush.msrb.mxu0 %v163_v20  ;;  %275 = vmatpush.msra.mxu2 %v163_v20 }
  0x32   :  { %236 = vmatpush.msrb.mxu1 %v211_v37  ;;  %289 = vmatpush.msra.mxu3 %v210_v39 }
  0x33   :  { %195 = vmatpush.msrb.mxu0 %v162_v21  ;;  %276 = vmatpush.msra.mxu2 %v162_v21 }
  0x34   :  { %237 = vmatpush.msrb.mxu1 %v210_v39  ;;  %290 = vmatpush.msra.mxu3 %v209_v41 }
  0x35   :  { %196 = vmatpush.msrb.mxu0 %v161_v22  ;;  %277 = vmatpush.msra.mxu2 %v161_v22 }
  0x36   :  { %238 = vmatpush.msrb.mxu1 %v209_v41  ;;  %291 = vmatpush.msra.mxu3 %v208_v46 }
  0x38   :  { %239 = vmatpush.msrb.mxu1 %v208_v46  ;;  %292 = vmatpush.msra.mxu3 %v207_v47 }
  0x3a   :  { %240 = vmatpush.msrb.mxu1 %v207_v47  ;;  %293 = vmatpush.msra.mxu3 %v206_v48 }
  0x3c   :  { %241 = vmatpush.msrb.mxu1 %v206_v48 }
  0x93   :  { %v119_v34 = vpop.f32.mrf.mxu0  ;;  %v147_v35 = vpop.f32.mrf.mxu1 }
  0x94   :  { %v148_v36 = vadd.f32 %v147_v35, %v119_v34 }
  0x96   :  { %v157_v38 = vadd.f32 %v300_v32, %v148_v36 }
  0x98   :  { %v159_v40 = vmax.f32 %v157_v38, 0.0 }
  0x9a   :  { %197 = vmatmul.f32.vlgmr.msrb.gmra.mxu0 %v159_v40 }
  0x9b   :  { %v150_v42 = vpop.f32.mrf.mxu1 }
  0x9c   :  { %v151_v43 = vadd.f32 %v150_v42, %v119_v34 }
  0x9e   :  { %v158_v44 = vadd.f32 %v300_v32, %v151_v43 }
  0xa0   :  { %v160_v45 = vmax.f32 %v158_v44, 0.0 }
  0xa2   :  { %200 = vmatmul.f32.vlgmr.msra.gmra.mxu2 %v160_v45 }
 0x117   :  { %v198_v50 = vpop.f32.mrf.mxu0 }
 0x118   :  { %v199_v51 = vadd.f32 %v301_v49, %v198_v50 }
 0x11a   :  { %v204_v52 = vmax.f32 %v199_v51, 0.0 }
 0x11c   :  { %242 = vmatmul.f32.vlgmr.msrb.gmra.mxu1 %v204_v52 }
 0x125   :  { %v201_v53 = vpop.f32.mrf.mxu2 }
 0x126   :  { %v202_v54 = vadd.f32 %v301_v49, %v201_v53 }
 0x128   :  { %v205_v55 = vmax.f32 %v202_v54, 0.0 }
 0x12a   :  { %245 = vmatmul.f32.vlgmr.msra.gmra.mxu3 %v205_v55 }
 0x199   :  { %v243_v57 = vpop.f32.mrf.mxu1 }
 0x19a   :  { %v244_v58 = vadd.f32 %v302_v56, %v243_v57 }
 0x19c   :  { %250 = vst.msk [vmem:[%s596_s9] sm:$0xff] %vm249_vm1, %v244_v58 }
 0x1ad   :  { %v246_v59 = vpop.f32.mrf.mxu3 }
 0x1ae   :  { %v247_v60 = vadd.f32 %v302_v56, %v246_v59 }
 0x1b0   :  { %251 = vst.msk [vmem:[%s596_s9 + $0x8] sm:$0xff] %vm249_vm1, %v247_v60 }
 0x1b1   :  { %256 = vsyncpa [#allocation3], 1 }
 0x1b2   :  { %257 = vsyncpa [#allocation5], 1 }
 0x1b3   :  { %258 = vsyncpa [#allocation8], 1 }

</bundles_post_ra>
